<compile_context>
chip_gen: v5e
topology: v5e:2x2
jax: 0.10.0
libtpu: 0.0.40
codegen_flags: <defaults>
</compile_context>

<pallas_src>
import functools

import numpy as np
import jax
import jax.numpy as jnp
from jax.experimental import pallas as pl
from jax.experimental.pallas import tpu as pltpu

_EPS = 1e-8  # torch.nn.CosineSimilarity default eps


# ----------------------------- Pallas kernel ---------------------------------
def triplet_loss_kernel(xn_ref, xnt_ref, neg_idx_ref, sw_ref, mw_ref, out_ref,
                        *, col_chunk):
    """One row tile of anchors.

    xn_ref      : [TM, D]  normalized anchor embeddings (pipelined row tile)
    xnt_ref     : [D,  N]  normalized embeddings, transposed (resident, MXU-friendly)
    neg_idx_ref : [TM, N]  int32 negative indices
    sw_ref      : [TM, N]  folded 0.5 * (-1)^flip * (valid + flip)
    mw_ref      : [TM, N]  folded margin * (valid + flip)
    out_ref     : [TM, 1]  per-row partial hinge sums
    """
    tm, _ = xn_ref.shape
    n = xnt_ref.shape[1]
    jc = col_chunk

    # Pairwise cosine similarity for this row tile on the MXU (rhs already [K, N]).
    cos = jax.lax.dot_general(
        xn_ref[...], xnt_ref[...], (((1,), (0,)), ((), ())),
        preferred_element_type=jnp.float32)                      # [TM, N] f32

    col = jax.lax.broadcasted_iota(jnp.int32, (1, 1, n), 2)      # [1, 1, N]

    acc = jnp.zeros((tm, 1), jnp.float32)
    # Static (unrolled) chunk loop over the j axis: the one-hot intermediate is
    # bounded to [TM, Jc, N] and reduced immediately.
    for c in range(n // jc):
        j0 = c * jc
        ni = neg_idx_ref[:, j0:j0 + jc]                          # [TM, Jc] int32
        swc = sw_ref[:, j0:j0 + jc]                              # [TM, Jc]
        mwc = mw_ref[:, j0:j0 + jc]                              # [TM, Jc]

        # cos_neg[r, j] = cos[r, ni[r, j]] via iota-compare one-hot + lane reduce.
        hit = ni[:, :, None] == col                              # [TM, Jc, N] bool
        cos_neg = jnp.sum(jnp.where(hit, cos[:, None, :], 0.0), axis=-1)  # [TM, Jc]

        cos_pos = cos[:, j0:j0 + jc]                             # positives are arange
        # d_pos - d_neg = 0.5*(cos_neg - cos_pos); 0.5, sign and (valid+flip) are
        # folded into sw, margin*(valid+flip) into mw (host-side).
        hinge = jnp.maximum((cos_neg - cos_pos) * swc + mwc, 0.0)
        acc = acc + jnp.sum(hinge, axis=1, keepdims=True)

    out_ref[...] = acc


# ------------------------------- wrapper --------------------------------------
def _round_up(a, b):
    return ((a + b - 1) // b) * b


def _vmem_limit_bytes(tm, d, n_cols, jc, emb_bytes):
    """Budget from actual buffer sizes (double-buffered tiles + chunk temps)."""
    lhs = 2 * tm * d * emb_bytes                 # xn row tile (double-buffered)
    rhs = 2 * d * n_cols * emb_bytes             # resident xnT (budget 2x)
    meta = 2 * 3 * tm * n_cols * 4               # neg_idx + sw + mw tiles, 2 buffers
    cos = 2 * tm * n_cols * 4                    # cos + hinge-sized temporaries
    chunk = 4 * tm * jc * n_cols * 4             # one-hot compare/select temps
    out = 2 * tm * 4
    total = lhs + rhs + meta + cos + chunk + out
    try:  # clamp to physical VMEM of the current chip (64 MiB on v7x)
        cap = int(pltpu.get_tpu_info().vmem_capacity_bytes * 0.85)
    except Exception:
        cap = 54 * 1024 * 1024
    return int(min(cap, max(4 * 1024 * 1024, 2 * total)))


def triplet_loss_pallas(x, neg_idx, sw, mw, num_valid, *, row_tile=None,
                        col_chunk=None, matmul_dtype=jnp.float32):
    n, d = x.shape
    x = x.astype(jnp.float32)

    # Normalize once in the wrapper (torch CosineSimilarity semantics: 1/max(||x||, eps)).
    ssq = jnp.sum(x * x, axis=1, keepdims=True)
    xn = x * jax.lax.rsqrt(jnp.maximum(ssq, _EPS * _EPS))
    xnt = xn.T                                                   # [D, N] resident rhs

    # Row-tile selection + padding (always tiled; never one giant grid step).
    if row_tile is None:
        row_tile = 128 if n >= 128 else _round_up(n, 8)
    row_tile = max(8, _round_up(int(row_tile), 8))
    n_rows = _round_up(n, row_tile)

    # Column (positive/negative index) axis padded to a lane-friendly size.
    n_cols = _round_up(n, 128) if n > 128 else _round_up(n, 8)

    # Chunk size for the gather: keep the [TM, Jc, N] intermediate ~4 MiB.
    if col_chunk is None:
        target = max(8, (4 * 1024 * 1024) // max(1, row_tile * n_cols * 4))
        col_chunk = min(n_cols, target)
    col_chunk = max(1, min(int(col_chunk), n_cols))
    while n_cols % col_chunk:
        col_chunk -= 1

    # Host-side padding: padded rows/columns have sw = mw = 0 and in-range neg_idx,
    # so they contribute exactly 0 to the hinge sum.
    xn_p = jnp.pad(xn, ((0, n_rows - n), (0, 0))).astype(matmul_dtype)
    xnt_p = jnp.pad(xnt, ((0, 0), (0, n_cols - n))).astype(matmul_dtype)
    neg_idx_p = jnp.pad(neg_idx.astype(jnp.int32),
                        ((0, n_rows - n), (0, n_cols - n)), constant_values=0)
    sw_p = jnp.pad(sw.astype(jnp.float32), ((0, n_rows - n), (0, n_cols - n)))
    mw_p = jnp.pad(mw.astype(jnp.float32), ((0, n_rows - n), (0, n_cols - n)))

    emb_bytes = jnp.dtype(matmul_dtype).itemsize
    vmem_limit = _vmem_limit_bytes(row_tile, d, n_cols, col_chunk, emb_bytes)

    kernel = functools.partial(triplet_loss_kernel, col_chunk=col_chunk)
    partials = pl.pallas_call(
        kernel,
        out_shape=jax.ShapeDtypeStruct((n_rows, 1), jnp.float32),
        grid=(n_rows // row_tile,),
        in_specs=[
            pl.BlockSpec((row_tile, d), lambda i: (i, 0)),        # xn row tile
            pl.BlockSpec((d, n_cols), lambda i: (0, 0)),          # xnT, resident
            pl.BlockSpec((row_tile, n_cols), lambda i: (i, 0)),   # neg_idx tile
            pl.BlockSpec((row_tile, n_cols), lambda i: (i, 0)),   # sw tile
            pl.BlockSpec((row_tile, n_cols), lambda i: (i, 0)),   # mw tile
        ],
        out_specs=pl.BlockSpec((row_tile, 1), lambda i: (i, 0)),  # per-row partials
        compiler_params=pltpu.CompilerParams(
            dimension_semantics=("parallel",),   # independent row tiles (megacore OK)
            vmem_limit_bytes=vmem_limit,
        ),
    )(xn_p, xnt_p, neg_idx_p, sw_p, mw_p)

    # Final reduction + normalization in the wrapper (tiny; keeps the grid parallel).
    # num_valid clamp avoids the reference's divide-by-zero NaN (documented divergence).
    return jnp.sum(partials) / jnp.maximum(jnp.float32(num_valid), 1.0)


# --------------------------- Host-side metadata -------------------------------
def _tree_distance(a, b):
    # TODO(synk): the original walks a networkx label-hierarchy graph
    # (build_hierarchy_graph + tree_distance); here a deterministic synthetic
    # 2-level hierarchy: leaves a, b share parent a // 2.
    if a == b:
        return 0.0
    if a // 2 == b // 2:
        return 2.0
    return 4.0


def build_triplet_metadata(labels, rng):
    """Mirrors TripletLoss.build_triplet / select_valid_samples (host-side glue)."""
    n = labels.shape[0]
    D = 1.0 / 4
    neg_idx = np.stack([rng.permutation(n) for _ in range(n)]).astype(np.int32)
    is_valid = np.zeros((n, n), np.float32)
    flip = np.zeros((n, n), np.float32)
    margins = np.zeros((n, n), np.float32)
    for i in range(n):
        for j in range(n):
            d_p = _tree_distance(int(labels[i]), int(labels[j]))
            d_n = _tree_distance(int(labels[i]), int(labels[neg_idx[i, j]]))
            margins[i, j] = 0.1 + 0.25 * abs(d_n - d_p) * D
            is_valid[i, j] = float(d_n > d_p)
            flip[i, j] = float(d_n < d_p)
    return neg_idx, is_valid, flip, margins


def fold_metadata(is_valid, flip, margins):
    """Fold masks/margins into two arrays + num_valid scalar."""
    w = is_valid + flip                                   # in {0, 1}
    sw = (0.5 * ((-1.0) ** flip) * w).astype(np.float32)  # 0.5 * sign * weight
    mw = (margins * w).astype(np.float32)                 # margin * weight
    num_valid = float(w.sum())
    return sw, mw, num_valid


def reference_loss(x, neg_idx, is_valid, flip, margins):
    """Pure numpy mirror of TripletLoss.forward for a correctness check."""
    norm = np.maximum(np.linalg.norm(x, axis=1, keepdims=True), _EPS)
    xn = x / norm
    cos = xn @ xn.T
    d = 0.5 * (1.0 - cos)
    d_neg = np.take_along_axis(d, neg_idx, axis=1)
    sign = (-1.0) ** flip
    l = (d - d_neg) * sign + margins
    w = is_valid + flip
    l = np.maximum(l * w, 0.0)
    return l.sum() / w.sum()


# ----------------------------------- main -------------------------------------
if __name__ == "__main__":
    N, Dfeat, n_classes = 16, 32, 6
    key = jax.random.PRNGKey(0)
    kx, kl = jax.random.split(key)
    x = jax.random.normal(kx, (N, Dfeat), dtype=jnp.float32)
    labels = jax.random.randint(kl, (N,), 0, n_classes, dtype=jnp.int32)

    rng = np.random.RandomState(0)  # deterministic negative permutations
    neg_idx, is_valid, flip, margins = build_triplet_metadata(np.asarray(labels), rng)
    sw, mw, num_valid = fold_metadata(is_valid, flip, margins)

    # row_tile=8 -> 2 grid steps; col_chunk=8 -> 2 gather chunks per step
    # (exercises both the parallel grid and the chunked-gather path).
    loss = triplet_loss_pallas(
        x,
        jnp.asarray(neg_idx),
        jnp.asarray(sw),
        jnp.asarray(mw),
        num_valid,
        row_tile=8,
        col_chunk=8,
    )
    loss = jax.block_until_ready(loss)

    ref = reference_loss(np.asarray(x, np.float32), neg_idx, is_valid, flip, margins)
    assert np.allclose(float(loss), ref, rtol=1e-4, atol=1e-5), (float(loss), ref)
    print("KERNEL_OK")
</pallas_src>

<mosaic_0001>
module attributes {stable_mosaic.version = 11 : i64} {
  func.func @triplet_loss_kernel(%arg0: i32, %arg1: memref<8x32xf32, #tpu.memory_space<vmem>>, %arg2: memref<32x16xf32, #tpu.memory_space<vmem>>, %arg3: memref<8x16xi32, #tpu.memory_space<vmem>>, %arg4: memref<8x16xf32, #tpu.memory_space<vmem>>, %arg5: memref<8x16xf32, #tpu.memory_space<vmem>>, %arg6: memref<8x1xf32, #tpu.memory_space<vmem>>) attributes {dimension_semantics = [#tpu.dimension_semantics<parallel>], iteration_bounds = array<i64: 2>, scalar_prefetch = 0 : i64, scratch_operands = 0 : i64, tpu.core_type = #tpu.core_type<tc>, window_params = [{transform_indices = @transform_0, window_bounds = array<i64: 8, 32>}, {pipeline_mode = #tpu.pipeline_mode<synchronous>, transform_indices = @transform_1, window_bounds = array<i64: 32, 16>}, {transform_indices = @transform_2, window_bounds = array<i64: 8, 16>}, {transform_indices = @transform_3, window_bounds = array<i64: 8, 16>}, {transform_indices = @transform_4, window_bounds = array<i64: 8, 16>}, {transform_indices = @transform_5, window_bounds = array<i64: 8, 1>}]} {
    %c0 = arith.constant 0 : index
    %c0_0 = arith.constant 0 : index
    %0 = vector.load %arg1[%c0, %c0_0] : memref<8x32xf32, #tpu.memory_space<vmem>>, vector<8x32xf32>
    %c0_1 = arith.constant 0 : index
    %c0_2 = arith.constant 0 : index
    %1 = vector.load %arg2[%c0_1, %c0_2] : memref<32x16xf32, #tpu.memory_space<vmem>>, vector<32x16xf32>
    %cst = arith.constant dense<0.000000e+00> : vector<8x16xf32>
    %2 = tpu.matmul %0, %1, %cst {dimension_numbers = #tpu.dot_dimension_numbers<[1], [0], [0], [1], [0, 0, 1, 1], [], []>} : vector<8x32xf32>, vector<32x16xf32>, vector<8x16xf32> -> vector<8x16xf32>
    %3 = tpu.iota {dimensions = array<i32: 2>} : vector<1x1x16xi32>
    %cst_3 = arith.constant 0.000000e+00 : f32
    %4 = vector.broadcast %cst_3 : f32 to vector<8x1xf32>
    %c0_4 = arith.constant 0 : index
    %c0_5 = arith.constant 0 : index
    %5 = vector.load %arg3[%c0_4, %c0_5] : memref<8x16xi32, #tpu.memory_space<vmem>>, vector<8x8xi32>
    %c0_6 = arith.constant 0 : index
    %c0_7 = arith.constant 0 : index
    %6 = vector.load %arg4[%c0_6, %c0_7] : memref<8x16xf32, #tpu.memory_space<vmem>>, vector<8x8xf32>
    %c0_8 = arith.constant 0 : index
    %c0_9 = arith.constant 0 : index
    %7 = vector.load %arg5[%c0_8, %c0_9] : memref<8x16xf32, #tpu.memory_space<vmem>>, vector<8x8xf32>
    %8 = vector.shape_cast %5 : vector<8x8xi32> to vector<8x8x1xi32>
    %9 = vector.broadcast %8 : vector<8x8x1xi32> to vector<8x8x16xi32>
    %10 = vector.broadcast %3 : vector<1x1x16xi32> to vector<8x8x16xi32>
    %11 = arith.cmpi eq, %9, %10 : vector<8x8x16xi32>
    %12 = vector.shape_cast %2 : vector<8x16xf32> to vector<8x1x16xf32>
    %cst_10 = arith.constant 0.000000e+00 : f32
    %13 = vector.shape_cast %12 : vector<8x1x16xf32> to vector<8x1x16xf32>
    %14 = vector.broadcast %13 : vector<8x1x16xf32> to vector<8x8x16xf32>
    %15 = vector.broadcast %cst_10 : f32 to vector<8x8x16xf32>
    %16 = arith.select %11, %14, %15 : vector<8x8x16xi1>, vector<8x8x16xf32>
    %cst_11 = arith.constant dense<0.000000e+00> : vector<8x8xf32>
    %17 = vector.multi_reduction <add>, %16, %cst_11 [2] : vector<8x8x16xf32> to vector<8x8xf32>
    %18 = vector.extract_strided_slice %2 {offsets = [0, 0], sizes = [8, 8], strides = [1, 1]} : vector<8x16xf32> to vector<8x8xf32>
    %19 = arith.subf %17, %18 : vector<8x8xf32>
    %20 = arith.mulf %19, %6 : vector<8x8xf32>
    %21 = arith.addf %20, %7 : vector<8x8xf32>
    %cst_12 = arith.constant 0.000000e+00 : f32
    %22 = vector.broadcast %cst_12 : f32 to vector<8x8xf32>
    %23 = arith.maximumf %21, %22 : vector<8x8xf32>
    %cst_13 = arith.constant dense<0.000000e+00> : vector<8xf32>
    %24 = vector.multi_reduction <add>, %23, %cst_13 [1] : vector<8x8xf32> to vector<8xf32>
    %25 = vector.shape_cast %24 : vector<8xf32> to vector<8x1xf32>
    %26 = arith.addf %4, %25 : vector<8x1xf32>
    %c0_14 = arith.constant 0 : index
    %c8 = arith.constant 8 : index
    %27 = vector.load %arg3[%c0_14, %c8] : memref<8x16xi32, #tpu.memory_space<vmem>>, vector<8x8xi32>
    %c0_15 = arith.constant 0 : index
    %c8_16 = arith.constant 8 : index
    %28 = vector.load %arg4[%c0_15, %c8_16] : memref<8x16xf32, #tpu.memory_space<vmem>>, vector<8x8xf32>
    %c0_17 = arith.constant 0 : index
    %c8_18 = arith.constant 8 : index
    %29 = vector.load %arg5[%c0_17, %c8_18] : memref<8x16xf32, #tpu.memory_space<vmem>>, vector<8x8xf32>
    %30 = vector.shape_cast %27 : vector<8x8xi32> to vector<8x8x1xi32>
    %31 = vector.broadcast %30 : vector<8x8x1xi32> to vector<8x8x16xi32>
    %32 = vector.broadcast %3 : vector<1x1x16xi32> to vector<8x8x16xi32>
    %33 = arith.cmpi eq, %31, %32 : vector<8x8x16xi32>
    %34 = vector.shape_cast %2 : vector<8x16xf32> to vector<8x1x16xf32>
    %cst_19 = arith.constant 0.000000e+00 : f32
    %35 = vector.shape_cast %34 : vector<8x1x16xf32> to vector<8x1x16xf32>
    %36 = vector.broadcast %35 : vector<8x1x16xf32> to vector<8x8x16xf32>
    %37 = vector.broadcast %cst_19 : f32 to vector<8x8x16xf32>
    %38 = arith.select %33, %36, %37 : vector<8x8x16xi1>, vector<8x8x16xf32>
    %cst_20 = arith.constant dense<0.000000e+00> : vector<8x8xf32>
    %39 = vector.multi_reduction <add>, %38, %cst_20 [2] : vector<8x8x16xf32> to vector<8x8xf32>
    %40 = vector.extract_strided_slice %2 {offsets = [0, 8], sizes = [8, 8], strides = [1, 1]} : vector<8x16xf32> to vector<8x8xf32>
    %41 = arith.subf %39, %40 : vector<8x8xf32>
    %42 = arith.mulf %41, %28 : vector<8x8xf32>
    %43 = arith.addf %42, %29 : vector<8x8xf32>
    %cst_21 = arith.constant 0.000000e+00 : f32
    %44 = vector.broadcast %cst_21 : f32 to vector<8x8xf32>
    %45 = arith.maximumf %43, %44 : vector<8x8xf32>
    %cst_22 = arith.constant dense<0.000000e+00> : vector<8xf32>
    %46 = vector.multi_reduction <add>, %45, %cst_22 [1] : vector<8x8xf32> to vector<8xf32>
    %47 = vector.shape_cast %46 : vector<8xf32> to vector<8x1xf32>
    %48 = arith.addf %26, %47 : vector<8x1xf32>
    %c0_23 = arith.constant 0 : index
    %c0_24 = arith.constant 0 : index
    %49 = vector.load %arg6[%c0_23, %c0_24] : memref<8x1xf32, #tpu.memory_space<vmem>>, vector<8x1xf32>
    tpu.vector_store %arg6[%c0_23, %c0_24], %48 {strides = array<i32>} : memref<8x1xf32, #tpu.memory_space<vmem>>, vector<8x1xf32>,
    return
  }
  func.func @transform_0(%arg0: i32) -> (i32, i32) {
    %c0_i32 = arith.constant 0 : i32
    %c0_i32_0 = arith.constant 0 : i32
    return %arg0, %c0_i32 : i32, i32
  }
  func.func @transform_1(%arg0: i32) -> (i32, i32) {
    %c0_i32 = arith.constant 0 : i32
    %c0_i32_0 = arith.constant 0 : i32
    %c0_i32_1 = arith.constant 0 : i32
    return %c0_i32, %c0_i32_0 : i32, i32
  }
  func.func @transform_2(%arg0: i32) -> (i32, i32) {
    %c0_i32 = arith.constant 0 : i32
    %c0_i32_0 = arith.constant 0 : i32
    return %arg0, %c0_i32 : i32, i32
  }
  func.func @transform_3(%arg0: i32) -> (i32, i32) {
    %c0_i32 = arith.constant 0 : i32
    %c0_i32_0 = arith.constant 0 : i32
    return %arg0, %c0_i32 : i32, i32
  }
  func.func @transform_4(%arg0: i32) -> (i32, i32) {
    %c0_i32 = arith.constant 0 : i32
    %c0_i32_0 = arith.constant 0 : i32
    return %arg0, %c0_i32 : i32, i32
  }
  func.func @transform_5(%arg0: i32) -> (i32, i32) {
    %c0_i32 = arith.constant 0 : i32
    %c0_i32_0 = arith.constant 0 : i32
    return %arg0, %c0_i32 : i32, i32
  }
}

</mosaic_0001>

<bundles_post_ra>
// kernel: tpu_custom_call.1
= control target key start
LH: loop header
LB: loop body
LE: loop exit
PB: predicated region body
PF: predicated region fallthrough
CT: control target
= control target key end

     0   :  { %10 = vsyncpa [#allocation3], 0  ;;  %s1847_s0 = inlined_call_operand.vmem [shape: f32[16,32], index: 0, kind: input, shape index: {}]   ;;  %s1848_s1 = inlined_call_operand.vmem [shape: f32[32,16], index: 1, kind: input, shape index: {}]   ;;  %s1849_s2 = inlined_call_operand.vmem [shape: s32[16,16], index: 2, kind: input, shape index: {}]   ;;  %s1850_s3 = inlined_call_operand.vmem [shape: f32[16,16], index: 3, kind: input, shape index: {}]   ;;  %s1851_s4 = inlined_call_operand.hbm [shape: f32[16,16], index: 4, kind: input, shape index: {}]   ;;  %s1852_s5 = inlined_call_operand.vmem [shape: f32[16,1], index: 5, kind: output, shape index: {}]  }
   0x1   :  { %12 = vsyncpa [#allocation3 + $0x1], 0  ;;  %s1340_s18 = smov 0   ;;  %s1342_s19 = smov 0  }
   0x2   :  { %s1344_s20 = smov 0   ;;  %s1346_s21 = smov 0  }
   0x3 LB: > { %s1359_s22 = sadd.s32 4294967295, %s1307_s21   ;;  %s1362_s23 = sadd.s32 1, %s1307_s21   ;;  %s1307_s21 = sphi %s1346_s21, %s1883_s21   ;;  %s1303_s20 = sphi %s1344_s20, %s1882_s20   ;;  %s1299_s19 = sphi %s1342_s19, %s1881_s19   ;;  %s1295_s18 = sphi %s1340_s18, %s1880_s18  }
   0x4   : > { %s121_s24 = ssub.s32 %s1307_s21, %s1362_s23  ;;  %s124_s25 = sadd.s32 1, %s1303_s20 }
   0x5   : > { %p122_p0 = scmp.eq.s32.totalorder %s121_s24, 0  ;;  %p131_p1 = scmp.ne.s32.totalorder %s1303_s20, %s1299_s19 }
   0x6   : > { %p132_p2 = scmp.eq.s32.totalorder %s1307_s21, 0  ;;  %p137_p3 = scmp.ne.s32.totalorder %s1299_s19, %s1295_s18 }
   0x7   : > { %s1372_s26 = scalar_select %p122_p0, %s1303_s20, %s124_s25  }
   0x8   : > { %p1374_p4 = por %p132_p2, %p131_p1  ;;  %p138_p5 = scmp.eq.s32.totalorder %s1359_s22, 0 }
   0x9   : > { %p1196_p6 = scmp.lt.s32.totalorder %s1307_s21, 2  ;;  %s211_s29 = sand.u32 1, %s1303_s20  }
   0xa   : > { %p1380_p7 = por %p138_p5, %p137_p3  ;;  %s1179_s30 = sshll.u32 %s211_s29, 3 }
   0xb   : > { %s1180_s6 = sshll.u32 %s1307_s21, 3  ;;  %s215_s10 = scalar_lea.vmem [#allocation2], %s1179_s30 }
   0xc   : > { %s219_s9 = scalar_lea.hbm %s1851_s4, %s1180_s6  ;;  %s223_s11 = sshll.u32 %s215_s10, 4  ;;  %s224_s11 = int_to_ptr.vmem [resolvable:$true] %s223_s11 }
   0xd   : > { %s221_s12 = sshll.u32 %s219_s9, 4  ;;  %p1391_p8 = pnand %p1196_p6, %p1374_p4  ;;  %s222_s12 = int_to_ptr.hbm [resolvable:$true] %s221_s12 }
   0xe   : > { %p1181_p9 = scmp.ge.s32.totalorder %s1307_s21, 1  ;;  %p228_p10 = scmp.lt.s32.totalorder %s1307_s21, 3 }
   0xf   : > { %s212_s14 = scalar_lea.sflag [#allocation3], %s211_s29  ;;  %s1243_s15 = sshra.s32 %s222_s12, 4  ;;  %s1244_s15 = int_to_ptr.hbm [resolvable:$true] %s1243_s15 }
  0x10   : > { %s1245_s16 = scalar_lea.hbm %s1244_s15, 8  ;;  %p1247_p12 = pneg %p1391_p8 }
  0x11   : > { %p1246_p11 = scmp.ne.s32.totalorder %s1244_s15, %s1245_s16  ;;  %s1250_s24 = scalar_lea.hbm %s1851_s4, 16 }
  0x12   : > { %p1251_p1 = scmp.lt.s32.totalorder %s1244_s15, %s1851_s4  ;;  %p1252_p2 = scmp.lt.s32.totalorder %s1250_s24, %s1245_s16 }
  0x13   : > { %p1248_p13 = pnand %p1247_p12, %p1246_p11 }
  0x14   : > { %p1253_p3 = por %p1252_p2, %p1251_p1 }
  0x15   : > { %p1249_p0 = pneg %p1248_p13 }
  0x17   : > { %p1254_p4 = pnand %p1253_p3, %p1249_p0 }
  0x19   : > { %1257 = shalt.err (!%p1254_p4)
}
  0x1a   : > { %1195 = dma.hbm_to_vmem [thread:$0]  (!%p1391_p8), %s222_s12, 128, %s224_s11, %s212_s14  }
  0x1b   : > { %p229_p5 = pnand %p1181_p9, %p228_p10 }
  0x1c   : > { %s234_s29 = sand.u32 (!%p229_p5), 1, %s1299_s19  }
  0x1d   : > { %232 = sbr.rel (%p229_p5) target bundleno = 870 (0x366), region = 40  ;;  %s1412_s30 = sshll.u32 (!%p229_p5), %s234_s29, 3 }
  0x1e   : > { %s235_s6 = scalar_lea.sflag (!%p229_p5), [#allocation3], %s234_s29  ;;  %s238_s7 = scalar_lea.vmem (!%p229_p5), [#allocation2], %s1412_s30 }
  0x22   : > { %1290 = dma.done.wait (%p1380_p7), %s235_s6, 128  }
  0x23   : > { %1292 = vsyncadd (%p1380_p7), %s235_s6, 4294967168  ;;  %v322_v0 = vlaneseq  ;;  %p277_p6 = scmp.lt.s32.totalorder %s1359_s22, 1  ;;  %v297_v2 = vld [vmem:[%s1848_s1 + $0x18] sm:$0xff]  ;;  %v296_v3 = vld [vmem:[%s1848_s1 + $0x10] sm:$0xff]  ;;  %vm298_vm0 = vcmask 261120   ;;  %vm423_vm2 = vcmask 130048  }
  0x24   : > { %314 = vmatpush.msra.mxu0 %v297_v2  ;;  %v295_v5 = vld [vmem:[%s1848_s1 + $0x8] sm:$0xff]  ;;  %v294_v9 = vld [vmem:[%s1848_s1] sm:$0xff] }
  0x25   : > { %v1421_v1 = vshrl.u32 %v322_v0, 7  ;;  %s1885_s22 = smov (!%p277_p6, %s1359_s22), 1  ;;  %v1502_v24 = vld [vmem:[%s238_s7] sm:$0xff]  ;;  %v1563_v44 = vand.u32 127, %v322_v0 }
  0x26   : > { %s1426_s21 = sshll.u32 %s1885_s22, 3  ;;  %315 = vmatpush.msra.mxu0 %v296_v3  ;;  %v1856_v25 = vperm.slane %v1502_v24, 0  ;;  %v1855_v27 = vperm.slane %v1502_v24, 2  ;;  %v1863_v28 = vperm.slane %v1502_v24, 3  ;;  %v600_v29 = vperm.slane %v1502_v24, 1 }
  0x27   : > { %1231 = vset.pattern.permute.xlu1 %v1421_v1  ;;  %1230 = vset.pattern.permute.xlu0 %v1421_v1  ;;  %s284_s28 = scalar_lea.vmem %s1849_s2, %s1426_s21  ;;  %s280_s17 = scalar_lea.vmem %s1847_s0, %s1426_s21  ;;  %v1853_v30 = vperm.slane %v1502_v24, 5  ;;  %v1862_v31 = vperm.slane %v1502_v24, 6  ;;  %v1864_v32 = vperm.slane %v1502_v24, 4  ;;  %v1552_v40 = vadd.s32 8, %v1421_v1 }
  0x28   : > { %1232 = vset.pattern.permute.xlu2 %v1421_v1  ;;  %v1439_v4 = vld [vmem:[%s284_s28] sm:$0xff]  ;;  %316 = vmatpush.msra.mxu0 %v295_v5  ;;  %s288_s29 = scalar_lea.vmem %s1850_s3, %s1426_s21  ;;  %s292_s7 = scalar_lea.vmem %s1852_s5, %s1426_s21 }
  0x29   : > { %v341_v6 = vperm.slane %v1439_v4, 2  ;;  %v327_v7 = vperm.slane %v1439_v4, 0  ;;  %v355_v8 = vperm.slane %v1439_v4, 4  ;;  %v293_v10 = vld [vmem:[%s280_s17] sm:$0xff]  ;;  %v348_v11 = vperm.slane %v1439_v4, 3 }
  0x2a   : > { %317 = vmatpush.msra.mxu0 %v294_v9  ;;  %v334_v12 = vperm.slane %v1439_v4, 1  ;;  %v362_v13 = vperm.slane %v1439_v4, 5  ;;  %v376_v14 = vperm.slane %v1439_v4, 7  ;;  %v369_v15 = vperm.slane %v1439_v4, 6  ;;  %v1477_v16 = vld [vmem:[%s288_s29] sm:$0xff] }
  0x2b   : > { %1187 = vmatmul.msk.f32.vlgmr.msra.gmra.mxu0 %vm298_vm0, %v293_v10  ;;  %v1857_v17 = vperm.slane %v1477_v16, 1  ;;  %v534_v18 = vperm.slane %v1477_v16, 2  ;;  %v520_v19 = vperm.slane %v1477_v16, 0  ;;  %v548_v20 = vperm.slane %v1477_v16, 4 }
  0x2c   : > { %v555_v21 = vperm.slane %v1477_v16, 5  ;;  %v541_v22 = vperm.slane %v1477_v16, 3  ;;  %v1860_v23 = vperm.slane %v1477_v16, 7  ;;  %v1854_v26 = vperm.slane %v1477_v16, 6 }
  0x2f   : > { %346 = vperm.xlu1 %1231, %v341_v6   ;;  %332 = vperm.xlu0 %1230, %v327_v7  }
  0x30   : > { %360 = vperm.xlu2 %1232, %v355_v8  }
  0x37   : > { %353 = vperm.xlu1 %1231, %v348_v11   ;;  %339 = vperm.xlu0 %1230, %v334_v12  }
  0x38   : > { %367 = vperm.xlu2 %1232, %v362_v13  }
  0x3f   : > { %381 = vperm.xlu1 %1231, %v376_v14   ;;  %374 = vperm.xlu0 %1230, %v369_v15  }
  0x40   : > { %532 = vperm.xlu2 %1232, %v1857_v17  }
  0x47   : > { %539 = vperm.xlu1 %1231, %v534_v18   ;;  %525 = vperm.xlu0 %1230, %v520_v19  }
  0x48   : > { %553 = vperm.xlu2 %1232, %v548_v20  }
  0x4f   : > { %560 = vperm.xlu1 %1231, %v555_v21   ;;  %546 = vperm.xlu0 %1230, %v541_v22  }
  0x50   : > { %574 = vperm.xlu2 %1232, %v1860_v23  }
  0x57   : > { %598 = vperm.xlu1 %1231, %v1856_v25   ;;  %567 = vperm.xlu0 %1230, %v1854_v26  }
  0x58   : > { %612 = vperm.xlu2 %1232, %v1855_v27  }
  0x5f   : > { %619 = vperm.xlu1 %1231, %v1863_v28   ;;  %605 = vperm.xlu0 %1230, %v600_v29  }
  0x60   : > { %633 = vperm.xlu2 %1232, %v1853_v30  }
  0x67   : > { %640 = vperm.xlu1 %1231, %v1862_v31   ;;  %626 = vperm.xlu0 %1230, %v1864_v32  }
  0x8a   : > { %v361_v50 = vpop.permute.xlu2 %360 }
  0x8b   : > { %vm387_vm6 = vcmp.eq.s32.totalorder %v361_v50, %v1563_v44 }
  0x92   : > { %v368_v1 = vpop.permute.xlu2 %367 }
  0x93   : > { %vm388_vm8 = vcmp.eq.s32.totalorder %v368_v1, %v1563_v44 }
  0xa1   : > { %v333_v43 = vpop.permute.xlu0 %332  ;;  %v347_v45 = vpop.permute.xlu1 %346 }
  0xa2   : > { %vm383_vm1 = vcmp.eq.s32.totalorder %v333_v43, %v1563_v44  ;;  %vm385_vm4 = vcmp.eq.s32.totalorder %v347_v45, %v1563_v44 }
  0xa8   : > { %v1530_v33 = vpop.f32.mrf.mxu0 }
  0xa9   : > { %v461_v34 = vperm.slane %v1530_v33, 2  ;;  %v454_v35 = vperm.slane %v1530_v33, 1  ;;  %v1535_v36 = vperm.slane %v1530_v33, 0  ;;  %v1859_v37 = vperm.slane %v1530_v33, 6  ;;  %v340_v48 = vpop.permute.xlu0 %339  ;;  %v354_v53 = vpop.permute.xlu1 %353 }
  0xaa   : > { %v475_v38 = vperm.slane %v1530_v33, 4  ;;  %v1861_v39 = vperm.slane %v1530_v33, 3  ;;  %v496_v41 = vperm.slane %v1530_v33, 7  ;;  %v482_v42 = vperm.slane %v1530_v33, 5 }
  0xab   : > { %466 = vperm.xlu2 %1232, %v461_v34   ;;  %459 = vperm.xlu1 %1231, %v454_v35   ;;  %v415_v46 = vsel %vm383_vm1, %v1535_v36, 0.0  ;;  %v394_v47 = vrot.slane %v1530_v33, 3  ;;  %v393_v49 = vrot.slane %v1530_v33, 2  ;;  %v392_v51 = vrot.slane %v1530_v33, 1 }
  0xac   : > { %452 = vperm.xlu0 %1230, %v1535_v36   ;;  %v424_v52 = vsel %vm423_vm2, %v415_v46, 0.0  ;;  %vm386_vm3 = vcmp.eq.s32.totalorder %v354_v53, %v1563_v44  ;;  %vm384_vm5 = vcmp.eq.s32.totalorder %v340_v48, %v1563_v44  ;;  %v395_v58 = vrot.slane %v1530_v33, 4 }
  0xad   : > { %v1571_v54 = vperm.slane %v394_v47, 0  ;;  %v1574_v55 = vperm.slane %v393_v49, 0  ;;  %v1577_v56 = vperm.slane %v392_v51, 0  ;;  %v397_v60 = vrot.slane %v1530_v33, 6 }
  0xae   : > { %v396_v62 = vrot.slane %v1530_v33, 5  ;;  %v1588_v3 = vperm.slane %v395_v58, 0  ;;  %v398_v45 = vrot.slane %v1530_v33, 7  ;;  %v1858_v58 = vperm.slane %v1502_v24, 7 }
  0xaf   : > { %v418_v57 = vsel %vm386_vm3, %v1571_v54, 0.0  ;;  %v417_v59 = vsel %vm385_vm4, %v1574_v55, 0.0  ;;  %v416_v61 = vsel %vm384_vm5, %v1577_v56, 0.0  ;;  %v1592_v9 = vperm.slane %v397_v60, 0  ;;  %v533_v60 = vpop.permute.xlu2 %532 }
  0xb0   : > { %v433_v0 = vsel %vm423_vm2, %v418_v57, 0.0  ;;  %v430_v2 = vsel %vm423_vm2, %v417_v59, 0.0  ;;  %v427_v5 = vsel %vm423_vm2, %v416_v61, 0.0  ;;  %v1595_v10 = vperm.slane %v396_v62, 0 }
  0xb1   : > { %v375_v63 = vpop.permute.xlu0 %374  ;;  %v419_v43 = vsel %vm387_vm6, %v1588_v3, 0.0  ;;  %v382_v47 = vpop.permute.xlu1 %381  ;;  %v1604_v51 = vperm.slane %v398_v45, 0  ;;  %vm715_vm3 = vcmask 1042434   ;;  %vm717_vm4 = vcmask 1043459  }
  0xb2   : > { %vm389_vm7 = vcmp.eq.s32.totalorder %v375_v63, %v1563_v44  ;;  %v420_v48 = vsel %vm388_vm8, %v1595_v10, 0.0  ;;  %v436_v49 = vsel %vm423_vm2, %v419_v43, 0.0  ;;  %vm390_vm9 = vcmp.eq.s32.totalorder %v382_v47, %v1563_v44 }
  0xb3   : > { %494 = vperm.xlu2 %1232, %v1859_v37   ;;  %480 = vperm.xlu1 %1231, %v475_v38   ;;  %v421_v46 = vsel %vm389_vm7, %v1592_v9, 0.0  ;;  %v422_v53 = vsel %vm390_vm9, %v1604_v51, 0.0  ;;  %vm719_vm5 = vcmask 1044484   ;;  %vm721_vm6 = vcmask 1045509  }
  0xb4   : > { %473 = vperm.xlu0 %1230, %v1861_v39   ;;  %v442_v50 = vsel %vm423_vm2, %v421_v46, 0.0  ;;  %v445_v57 = vsel %vm423_vm2, %v422_v53, 0.0  ;;  %vm723_vm7 = vcmask 1046534   ;;  %vm725_vm8 = vcmask 1047559  }
  0xb5   : > { %vm728_vm9 = vcmask 64512  }
  0xb7   : > { %v554_v62 = vpop.permute.xlu2 %553 }
  0xb9   : > { %v1616_v59 = vpop.permute.xlu0 %525  ;;  %v1626_v63 = vpop.permute.xlu1 %539 }
  0xbb   : > { %501 = vperm.xlu1 %1231, %v496_v41   ;;  %1235 = vset.pattern.permute.xlu2 %v1552_v40 }
  0xbc   : > { %487 = vperm.xlu0 %1230, %v482_v42  }
  0xc1   : > { %v1624_v61 = vpop.permute.xlu0 %546 }
  0xc3   : > { %1233 = vset.pattern.permute.xlu1 %v1552_v40 }
  0xdc   : > { %425 = vadd.xlane.f32.xlu2 %v424_v52  ;;  %v439_v52 = vsel %vm423_vm2, %v420_v48, 0.0 }
  0xe4   : > { %434 = vadd.xlane.f32.xlu2 %v433_v0 }
  0xe5   : > { %431 = vadd.xlane.f32.xlu1 %v430_v2 }
  0xe6   : > { %428 = vadd.xlane.f32.xlu0 %v427_v5 }
  0xec   : > { %437 = vadd.xlane.f32.xlu2 %v436_v49 }
  0xed   : > { %443 = vadd.xlane.f32.xlu1 %v442_v50 }
  0xee   : > { %440 = vadd.xlane.f32.xlu0 %v439_v52 }
  0xf4   : > { %446 = vadd.xlane.f32.xlu2 %v445_v57 }
 0x102   : > { %647 = vperm.xlu0 %1230, %v1858_v58  }
 0x106   : > { %737 = vperm.xlu1 %1233, %v327_v7   ;;  %v1632_v7 = vpop.permute.xlu0 %567 }
 0x10a   : > { %1234 = vset.pattern.permute.xlu0 %v1552_v40 }
 0x10e   : > { %749 = vperm.xlu1 %1233, %v341_v6   ;;  %v575_v6 = vpop.permute.xlu2 %574 }
 0x112   : > { %743 = vperm.xlu0 %1234, %v334_v12   ;;  %v1636_v12 = vpop.permute.xlu1 %560 }
 0x116   : > { %755 = vperm.xlu1 %1233, %v348_v11   ;;  %v606_v11 = vpop.permute.xlu0 %605  ;;  %v1640_v0 = vpop.permute.xlu2 %612 }
 0x11a   : > { %761 = vperm.xlu0 %1234, %v355_v8   ;;  %v1642_v1 = vpop.permute.xlu1 %598 }
 0x11e   : > { %767 = vperm.xlu1 %1233, %v362_v13   ;;  %v1644_v8 = vpop.permute.xlu0 %626  ;;  %v1646_v2 = vpop.permute.xlu2 %633 }
 0x122   : > { %773 = vperm.xlu0 %1234, %v369_v15   ;;  %v1648_v13 = vpop.permute.xlu1 %619 }
 0x126   : > { %779 = vperm.xlu1 %1233, %v376_v14   ;;  %v1650_v5 = vpop.permute.xlu2 %466  ;;  %v1652_v43 = vpop.permute.xlu0 %452 }
 0x12a   : > { %v1654_v15 = vpop.permute.xlu1 %640 }
 0x12e   : > { %v1656_v45 = vpop.permute.xlu2 %494  ;;  %v1658_v4 = vpop.permute.xlu0 %473 }
 0x132   : > { %v460_v14 = vpop.permute.xlu1 %459 }
 0x136   : > { %v1662_v47 = vpop.permute.xlu0 %487 }
 0x13a   : > { %v481_v48 = vpop.permute.xlu1 %480 }
 0x142   : > { %v502_v57 = vpop.permute.xlu1 %501 }
 0x14f   : > { %v1660_v46 = vpop.xlane.xlu2 %425 }
 0x157   : > { %v1664_v49 = vpop.xlane.xlu2 %434 }
 0x158   : > { %v1670_v58 = vpop.xlane.xlu1 %431 }
 0x159   : > { %v429_v50 = vpop.xlane.xlu0 %428 }
 0x15a   : > { %v512_v52 = vsub.f32 %v429_v50, %v460_v14 }
 0x15c   : > { %v585_v53 = vmul.f32 %v533_v60, %v512_v52  ;;  %v1309_v60 = vmov 0  }
 0x15d   : > { %1237 = vset.pattern.permute.xlu1 %v1309_v60 }
 0x15f   : > { %v438_v30 = vpop.xlane.xlu2 %437 }
 0x160   : > { %v515_v26 = vsub.f32 %v438_v30, %v481_v48  ;;  %v444_v39 = vpop.xlane.xlu1 %443 }
 0x161   : > { %v1666_v27 = vpop.xlane.xlu0 %440 }
 0x162   : > { %v588_v25 = vmul.f32 %v554_v62, %v515_v26  ;;  %v516_v17 = vsub.f32 %v1666_v27, %v1662_v47  ;;  %v1869_v27 = vperm.slane %v1502_v24, 3 }
 0x167   : > { %v447_v37 = vpop.xlane.xlu2 %446 }
 0x168   : > { %v518_v23 = vsub.f32 %v447_v37, %v502_v57 }
 0x16a   : > { %v591_v31 = vmul.f32 %v575_v6, %v518_v23 }
 0x174   : > { %v648_v28 = vpop.permute.xlu0 %647 }
 0x175   : > { %v1672_v32 = vadd.f32 %v648_v28, %v591_v31 }
 0x178   : > { %v738_v14 = vpop.permute.xlu1 %737 }
 0x179   : > { %vm781_vm10 = vcmp.eq.s32.totalorder %v738_v14, %v1563_v44 }
 0x17a   : > { %v789_v30 = vsel %vm781_vm10, %v1535_v36, 0.0  ;;  %vm1073_vm10 = vcmask 7168  }
 0x17b   : > { %v797_v26 = vsel %vm423_vm2, %v789_v30, 0.0 }
 0x17c   : > { %798 = vadd.xlane.f32.xlu0 %v797_v26 }
 0x180   : > { %v750_v62 = vpop.permute.xlu1 %749 }
 0x181   : > { %vm783_vm11 = vcmp.eq.s32.totalorder %v750_v62, %v1563_v44 }
 0x182   : > { %v791_v37 = vsel %vm783_vm11, %v1574_v55, 0.0 }
 0x183   : > { %v803_v23 = vsel %vm423_vm2, %v791_v37, 0.0 }
 0x184   : > { %v744_v28 = vpop.permute.xlu0 %743  ;;  %804 = vadd.xlane.f32.xlu1 %v803_v23 }
 0x185   : > { %vm782_vm12 = vcmp.eq.s32.totalorder %v744_v28, %v1563_v44 }
 0x186   : > { %v790_v31 = vsel %vm782_vm12, %v1577_v56, 0.0  ;;  %v658_v56 = vadd.f32 %v606_v11, %v585_v53  ;;  %v661_v53 = vadd.f32 %v1644_v8, %v588_v25  ;;  %v511_v25 = vsub.f32 %v1660_v46, %v1652_v43 }
 0x187   : > { %v800_v6 = vsel %vm423_vm2, %v790_v31, 0.0 }
 0x188   : > { %801 = vadd.xlane.f32.xlu2 %v800_v6  ;;  %v756_v48 = vpop.permute.xlu1 %755  ;;  %v666_v37 = vmax.f32 %v658_v56, 0.0 }
 0x189   : > { %vm784_vm13 = vcmp.eq.s32.totalorder %v756_v48, %v1563_v44 }
 0x18a   : > { %v792_v50 = vsel %vm784_vm13, %v1571_v54, 0.0 }
 0x18b   : > { %v806_v57 = vsel %vm423_vm2, %v792_v50, 0.0 }
 0x18c   : > { %v762_v52 = vpop.permute.xlu0 %761 }
 0x18d   : > { %vm785_vm14 = vcmp.eq.s32.totalorder %v762_v52, %v1563_v44 }
 0x18e   : > { %v793_v14 = vsel %vm785_vm14, %v1588_v3, 0.0  ;;  %v517_v3 = vsub.f32 %v444_v39, %v1656_v45  ;;  %v584_v39 = vmul.f32 %v1616_v59, %v511_v25  ;;  %v1872_v59 = vperm.slane %v1477_v16, 7 }
 0x18f   : > { %v809_v30 = vsel %vm423_vm2, %v793_v14, 0.0  ;;  %v1879_v45 = vperm.slane %v1502_v24, 5 }
 0x190   : > { %807 = vadd.xlane.f32.xlu2 %v806_v57  ;;  %v768_v55 = vpop.permute.xlu1 %767  ;;  %v590_v31 = vmul.f32 %v1632_v7, %v517_v3 }
 0x191   : > { %vm786_vm15 = vcmp.eq.s32.totalorder %v768_v55, %v1563_v44 }
 0x192   : > { %v794_v23 = vsel %vm786_vm15, %v1595_v10, 0.0  ;;  %v663_v10 = vadd.f32 %v1654_v15, %v590_v31 }
 0x193   : > { %v812_v11 = vsel %vm423_vm2, %v794_v23, 0.0 }
 0x194   : > { %v774_v28 = vpop.permute.xlu0 %773  ;;  %v671_v50 = vmax.f32 %v663_v10, 0.0 }
 0x195   : > { %vm787_vm1 = vcmp.eq.s32.totalorder %v774_v28, %v1563_v44 }
 0x196   : > { %v795_v6 = vsel %vm787_vm1, %v1592_v9, 0.0  ;;  %v657_v9 = vadd.f32 %v1642_v1, %v584_v39  ;;  %v1876_v1 = vperm.slane %v1502_v24, 0 }
 0x197   : > { %v815_v48 = vsel %vm423_vm2, %v795_v6, 0.0 }
 0x198   : > { %810 = vadd.xlane.f32.xlu2 %v809_v30  ;;  %v780_v26 = vpop.permute.xlu1 %779  ;;  %v665_v7 = vmax.f32 %v657_v9, 0.0 }
 0x199   : > { %vm788_vm0 = vcmp.eq.s32.totalorder %v780_v26, %v1563_v44 }
 0x19a   : > { %v796_v54 = vsel %vm788_vm0, %v1604_v51, 0.0  ;;  %v669_v51 = vmax.f32 %v661_v53, 0.0 }
 0x19b   : > { %v818_v62 = vsel %vm423_vm2, %v796_v54, 0.0  ;;  %vm713_vm2 = vcmask 1041409  }
 0x19c   : > { %819 = vadd.xlane.f32.xlu0 %v818_v62 }
 0x19d   : > { %685 = vperm.xlu1 %1237, %v666_v37  }
 0x1a0   : > { %813 = vadd.xlane.f32.xlu2 %v812_v11 }
 0x1a5   : > { %694 = vperm.xlu1 %1237, %v669_v51  }
 0x1a8   : > { %816 = vadd.xlane.f32.xlu2 %v815_v48 }
 0x1ad   : > { %700 = vperm.xlu1 %1237, %v671_v50  }
 0x1b0   : > { %837 = vperm.xlu0 %1234, %v461_v34   ;;  %v514_v34 = vsub.f32 %v1664_v49, %v1658_v4 }
 0x1b5   : > { %1238 = vset.pattern.permute.xlu1 %v1552_v40 }
 0x1b8   : > { %849 = vperm.xlu0 %1234, %v475_v38   ;;  %v587_v38 = vmul.f32 %v1624_v61, %v514_v34  ;;  %v1874_v61 = vperm.slane %v1502_v24, 7 }
 0x1bd   : > { %831 = vperm.xlu1 %1238, %v454_v35   ;;  %v660_v35 = vadd.f32 %v1648_v13, %v587_v38 }
 0x1c0   : > { %825 = vperm.xlu2 %1235, %v1535_v36   ;;  %867 = vperm.xlu0 %1234, %v496_v41   ;;  %v589_v36 = vmul.f32 %v1636_v12, %v516_v17  ;;  %v668_v41 = vmax.f32 %v660_v35, 0.0  ;;  %v1868_v17 = vperm.slane %v1502_v24, 4  ;;  %v1875_v12 = vperm.slane %v1477_v16, 1 }
 0x1c5   : > { %855 = vperm.xlu1 %1238, %v482_v42   ;;  %v662_v42 = vadd.f32 %v1646_v2, %v589_v36 }
 0x1c8   : > { %1236 = vset.pattern.permute.xlu2 %v1309_v60  ;;  %901 = vperm.xlu0 %1234, %v534_v18   ;;  %v670_v18 = vmax.f32 %v662_v42, 0.0 }
 0x1c9   : > { %682 = vperm.xlu2 %1236, %v665_v7  }
 0x1cd   : > { %889 = vperm.xlu1 %1238, %v520_v19   ;;  %v513_v19 = vsub.f32 %v1670_v58, %v1650_v5  ;;  %v1873_v58 = vperm.slane %v1530_v33, 6  ;;  %v1878_v5 = vperm.slane %v1477_v16, 6 }
 0x1d0   : > { %959 = vperm.xlu0 %1234, %v600_v29   ;;  %v1870_v29 = vperm.slane %v1502_v24, 6 }
 0x1d1   : > { %691 = vperm.xlu2 %1236, %v668_v41  }
 0x1d5   : > { %907 = vperm.xlu1 %1238, %v541_v22   ;;  %v586_v22 = vmul.f32 %v1626_v63, %v513_v19  ;;  %v672_v63 = vmax.f32 %v1672_v32, 0.0 }
 0x1d8   : > { %919 = vperm.xlu0 %1234, %v555_v21   ;;  %v1871_v21 = vperm.slane %v1530_v33, 3  ;;  %v1877_v33 = vperm.slane %v1502_v24, 2 }
 0x1d9   : > { %697 = vperm.xlu2 %1236, %v670_v18  }
 0x1dd   : > { %913 = vperm.xlu1 %1238, %v548_v20   ;;  %v659_v20 = vadd.f32 %v1640_v0, %v586_v22 }
 0x1e0   : > { %977 = vperm.xlu0 %1234, %v1868_v17  }
 0x1e1   : > { %1239 = vset.pattern.permute.xlu2 %v1552_v40  ;;  %v667_v40 = vmax.f32 %v659_v20, 0.0 }
 0x1e5   : > { %971 = vperm.xlu1 %1238, %v1869_v27  }
 0x1e8   : > { %989 = vperm.xlu0 %1234, %v1870_v29  }
 0x1e9   : > { %843 = vperm.xlu2 %1239, %v1871_v21  }
 0x1ed   : > { %931 = vperm.xlu1 %1238, %v1872_v59  }
 0x1ef   : > { %v799_v32 = vpop.xlane.xlu0 %798 }
 0x1f0   : > { %1240 = vset.pattern.permute.xlu0 %v1309_v60 }
 0x1f1   : > { %861 = vperm.xlu2 %1239, %v1873_v58   ;;  %688 = vperm.xlu0 %1240, %v667_v40  }
 0x1f5   : > { %995 = vperm.xlu1 %1238, %v1874_v61  }
 0x1f7   : > { %v805_v2 = vpop.xlane.xlu1 %804 }
 0x1f9   : > { %895 = vperm.xlu2 %1239, %v1875_v12   ;;  %703 = vperm.xlu0 %1240, %v672_v63  }
 0x1fb   : > { %v802_v0 = vpop.xlane.xlu2 %801 }
 0x1fd   : > { %1242 = vset.pattern.permute.xlu1 %v1309_v60 }
 0x201   : > { %953 = vperm.xlu2 %1239, %v1876_v1  }
 0x203   : > { %v808_v8 = vpop.xlane.xlu2 %807 }
 0x209   : > { %965 = vperm.xlu2 %1239, %v1877_v33  }
 0x20b   : > { %v1769_v13 = vpop.xlane.xlu2 %810 }
 0x20f   : > { %v686_v43 = vpop.permute.xlu1 %685  ;;  %v1777_v4 = vpop.xlane.xlu0 %819 }
 0x210   : > { %v706_v14 = vperm.slane %v686_v43, %v1563_v44 }
 0x211   : > { %925 = vperm.xlu2 %1239, %v1878_v5  }
 0x213   : > { %v1773_v15 = vpop.xlane.xlu2 %813 }
 0x217   : > { %v1781_v47 = vpop.permute.xlu1 %694 }
 0x218   : > { %v709_v40 = vperm.slane %v1781_v47, %v1563_v44 }
 0x219   : > { %983 = vperm.xlu2 %1239, %v1879_v45  }
 0x21b   : > { %v1779_v46 = vpop.xlane.xlu2 %816 }
 0x21f   : > { %v1784_v57 = vpop.permute.xlu1 %700 }
 0x221   : > { %1241 = vset.pattern.permute.xlu2 %v1309_v60 }
 0x222   : > { %v838_v49 = vpop.permute.xlu0 %837 }
 0x223   : > { %v826_v52 = vpop.permute.xlu2 %825  ;;  %v879_v18 = vsub.f32 %v805_v2, %v838_v49  ;;  %v711_v2 = vperm.slane %v1784_v57, %v1563_v44 }
 0x224   : > { %v877_v39 = vsub.f32 %v799_v32, %v826_v52 }
 0x22a   : > { %v850_v16 = vpop.permute.xlu0 %849 }
 0x22b   : > { %v683_v55 = vpop.permute.xlu2 %682  ;;  %v881_v21 = vsub.f32 %v1769_v13, %v850_v16 }
 0x22c   : > { %v705_v24 = vperm.slane %v683_v55, %v1563_v44 }
 0x22e   : > { %v714_v30 = vsel %vm713_vm2, %v706_v14, %v705_v24 }
 0x22f   : > { %v832_v56 = vpop.permute.xlu1 %831 }
 0x230   : > { %v878_v6 = vsub.f32 %v802_v0, %v832_v56 }
 0x232   : > { %v1789_v26 = vpop.permute.xlu0 %867 }
 0x233   : > { %v692_v54 = vpop.permute.xlu2 %691  ;;  %v884_v52 = vsub.f32 %v1777_v4, %v1789_v26 }
 0x234   : > { %v708_v58 = vperm.slane %v692_v54, %v1563_v44 }
 0x237   : > { %v1791_v62 = vpop.permute.xlu1 %855 }
 0x238   : > { %v882_v57 = vsub.f32 %v1773_v15, %v1791_v62 }
 0x23a   : > { %v902_v60 = vpop.permute.xlu0 %901 }
 0x23b   : > { %v698_v37 = vpop.permute.xlu2 %697  ;;  %v943_v19 = vmul.f32 %v902_v60, %v879_v18 }
 0x23f   : > { %v890_v23 = vpop.permute.xlu1 %889 }
 0x240   : > { %v941_v9 = vmul.f32 %v890_v23, %v877_v39 }
 0x242   : > { %v960_v28 = vpop.permute.xlu0 %959 }
 0x243   : > { %v844_v3 = vpop.permute.xlu2 %843 }
 0x244   : > { %v880_v41 = vsub.f32 %v808_v8, %v844_v3  ;;  %v710_v8 = vperm.slane %v698_v37, %v1563_v44 }
 0x247   : > { %v908_v11 = vpop.permute.xlu1 %907 }
 0x248   : > { %v944_v17 = vmul.f32 %v908_v11, %v880_v41 }
 0x24a   : > { %v920_v53 = vpop.permute.xlu0 %919 }
 0x24b   : > { %v862_v31 = vpop.permute.xlu2 %861  ;;  %v946_v56 = vmul.f32 %v920_v53, %v882_v57 }
 0x24c   : > { %v883_v32 = vsub.f32 %v1779_v46, %v862_v31 }
 0x24f   : > { %v914_v51 = vpop.permute.xlu1 %913 }
 0x250   : > { %v945_v63 = vmul.f32 %v914_v51, %v881_v21 }
 0x252   : > { %v978_v48 = vpop.permute.xlu0 %977 }
 0x253   : > { %v896_v10 = vpop.permute.xlu2 %895  ;;  %v1009_v43 = vadd.f32 %v978_v48, %v945_v63 }
 0x254   : > { %v942_v50 = vmul.f32 %v896_v10, %v878_v6 }
 0x255   : > { %v1017_v16 = vmax.f32 %v1009_v43, 0.0 }
 0x256   : > { %v1006_v25 = vadd.f32 %v960_v28, %v942_v50 }
 0x257   : > { %v972_v7 = vpop.permute.xlu1 %971 }
 0x258   : > { %v1014_v34 = vmax.f32 %v1006_v25, 0.0  ;;  %v1008_v27 = vadd.f32 %v972_v7, %v944_v17 }
 0x25a   : > { %1033 = vperm.xlu0 %1240, %v1014_v34   ;;  %v990_v38 = vpop.permute.xlu0 %989  ;;  %v1016_v12 = vmax.f32 %v1008_v27, 0.0 }
 0x25b   : > { %v954_v35 = vpop.permute.xlu2 %953 }
 0x25c   : > { %v1005_v36 = vadd.f32 %v954_v35, %v941_v9 }
 0x25e   : > { %v1013_v42 = vmax.f32 %v1005_v36, 0.0 }
 0x25f   : > { %v932_v61 = vpop.permute.xlu1 %931 }
 0x260   : > { %1030 = vperm.xlu2 %1241, %v1013_v42   ;;  %v948_v24 = vmul.f32 %v932_v61, %v884_v52 }
 0x263   : > { %v966_v22 = vpop.permute.xlu2 %965  ;;  %v689_v29 = vpop.permute.xlu0 %688 }
 0x264   : > { %v1007_v20 = vadd.f32 %v966_v22, %v943_v19  ;;  %v707_v59 = vperm.slane %v689_v29, %v1563_v44 }
 0x266   : > { %v1015_v0 = vmax.f32 %v1007_v20, 0.0  ;;  %v716_v1 = vsel %vm715_vm3, %v707_v59, %v714_v30 }
 0x267   : > { %v718_v33 = vsel %vm717_vm4, %v708_v58, %v716_v1  ;;  %v996_v14 = vpop.permute.xlu1 %995 }
 0x268   : > { %1039 = vperm.xlu2 %1241, %v1016_v12   ;;  %1036 = vperm.xlu1 %1242, %v1015_v0   ;;  %v720_v13 = vsel %vm719_vm5, %v709_v40, %v718_v33  ;;  %v1012_v54 = vadd.f32 %v996_v14, %v948_v24 }
 0x269   : > { %v722_v5 = vsel %vm721_vm6, %v710_v8, %v720_v13 }
 0x26a   : > { %v724_v45 = vsel %vm723_vm7, %v711_v2, %v722_v5  ;;  %v1020_v37 = vmax.f32 %v1012_v54, 0.0 }
 0x26b   : > { %v926_v47 = vpop.permute.xlu2 %925  ;;  %v704_v28 = vpop.permute.xlu0 %703 }
 0x26c   : > { %v947_v49 = vmul.f32 %v926_v47, %v883_v32  ;;  %v712_v4 = vperm.slane %v704_v28, %v1563_v44 }
 0x26e   : > { %v1011_v55 = vadd.f32 %v990_v38, %v947_v49  ;;  %v726_v26 = vsel %vm725_vm8, %v712_v4, %v724_v45 }
 0x26f   : > { %v729_v15 = vsel %vm728_vm9, %v726_v26, 0.0 }
 0x270   : > { %v1019_v30 = vmax.f32 %v1011_v55, 0.0  ;;  %1042 = vperm.xlu1 %1242, %v1017_v16  }
 0x272   : > { %1048 = vperm.xlu0 %1240, %v1019_v30  }
 0x273   : > { %v984_v46 = vpop.permute.xlu2 %983 }
 0x274   : > { %v1010_v60 = vadd.f32 %v984_v46, %v946_v56 }
 0x276   : > { %v1018_v23 = vmax.f32 %v1010_v60, 0.0 }
 0x278   : > { %1045 = vperm.xlu2 %1241, %v1018_v23   ;;  %1051 = vperm.xlu1 %1242, %v1020_v37  }
 0x2a1   : > { %730 = vadd.xlane.f32.xlu2 %v729_v15 }
 0x2ba   : > { %v1031_v62 = vpop.permute.xlu2 %1030 }
 0x2bb   : > { %v1053_v6 = vperm.slane %v1031_v62, %v1563_v44 }
 0x2c2   : > { %v1040_v53 = vpop.permute.xlu2 %1039 }
 0x2c3   : > { %v1056_v25 = vperm.slane %v1040_v53, %v1563_v44 }
 0x2cc   : > { %v1034_v3 = vpop.permute.xlu0 %1033 }
 0x2cd   : > { %v1054_v31 = vperm.slane %v1034_v3, %v1563_v44 }
 0x2cf   : > { %v1061_v48 = vsel %vm713_vm2, %v1054_v31, %v1053_v6 }
 0x2d2   : > { %v1046_v34 = vpop.permute.xlu2 %1045 }
 0x2d3   : > { %v1058_v35 = vperm.slane %v1046_v34, %v1563_v44 }
 0x2da   : > { %v1037_v11 = vpop.permute.xlu1 %1036 }
 0x2db   : > { %v1055_v51 = vperm.slane %v1037_v11, %v1563_v44 }
 0x2dd   : > { %v1062_v10 = vsel %vm715_vm3, %v1055_v51, %v1061_v48 }
 0x2de   : > { %v1063_v9 = vsel %vm717_vm4, %v1056_v25, %v1062_v10 }
 0x2e2   : > { %v1043_v50 = vpop.permute.xlu1 %1042 }
 0x2e3   : > { %v1057_v39 = vperm.slane %v1043_v50, %v1563_v44 }
 0x2e4   : > { %v1049_v38 = vpop.permute.xlu0 %1048 }
 0x2e5   : > { %v1064_v7 = vsel %vm719_vm5, %v1057_v39, %v1063_v9  ;;  %v1059_v36 = vperm.slane %v1049_v38, %v1563_v44 }
 0x2e6   : > { %v1065_v41 = vsel %vm721_vm6, %v1058_v35, %v1064_v7 }
 0x2e7   : > { %v1066_v17 = vsel %vm723_vm7, %v1059_v36, %v1065_v41 }
 0x2ea   : > { %v1052_v42 = vpop.permute.xlu1 %1051 }
 0x2eb   : > { %v1060_v18 = vperm.slane %v1052_v42, %v1563_v44 }
 0x2ed   : > { %v1067_v19 = vsel %vm725_vm8, %v1060_v18, %v1066_v17 }
 0x2ee   : > { %v1069_v27 = vsel %vm728_vm9, %v1067_v19, 0.0 }
 0x2ef   : > { %1070 = vadd.xlane.f32.xlu2 %v1069_v27 }
 0x314   : > { %v731_v22 = vpop.xlane.xlu2 %730 }
 0x362   : > { %v1071_v29 = vpop.xlane.xlu2 %1070 }
 0x363   : > { %v1072_v21 = vadd.f32 %v1071_v29, %v731_v22 }
 0x365   : > { %1074 = vst.msk [vmem:[%s292_s7] sm:$0xff] %vm1073_vm10, %v1072_v21 }
 0x366 PF: > { %p15_p7 = scmp.ge.s32.totalorder %s1362_s23, 4   ;;  %s1880_s18 = smov %s1299_s19 }
 0x367   : > { %s1881_s19 = smov %s1303_s20  ;;  %s1882_s20 = smov %s1372_s26 }
 0x368   : > { %s1883_s21 = smov %s1362_s23  ;;  %17 = sbr.rel (!%p15_p7) target bundleno = 3 (0x3), region = 89 }
 0x36d   :  { %1094 = vsyncpa [#allocation3], 1 }
 0x36e   :  { %1096 = vsyncpa [#allocation3 + $0x1], 1 }

</bundles_post_ra>
